<compile_context>
chip_gen: v7x
topology: tpu7x:2x2x1
jax: 0.10.0
libtpu: 0.0.40
codegen_flags: <defaults>
</compile_context>

<pallas_src>
import jax
import jax.numpy as jnp
from jax.experimental import pallas as pl
from jax.experimental.pallas import tpu as pltpu


def _node_gen_kernel(ne_ref, cc_ref, lab_ref, w_ne_ref, w_cc_ref, w_lab_ref,
                     b_ref, out_ref):
    # ne/cc: [bt, H] f32; lab: [bt, E] f32
    # w_*:   [H|E, 4H] bf16;  b: [1, 4H] f32;  out: [bt, 2H]
    pre = (
        jnp.dot(ne_ref[...].astype(jnp.bfloat16), w_ne_ref[...],
                preferred_element_type=jnp.float32)
        + jnp.dot(cc_ref[...].astype(jnp.bfloat16), w_cc_ref[...],
                  preferred_element_type=jnp.float32)
        + jnp.dot(lab_ref[...].astype(jnp.bfloat16), w_lab_ref[...],
                  preferred_element_type=jnp.float32)
        + b_ref[...]
    )                                            # [bt, 4H] f32
    half = pre.shape[-1] // 2
    t = jnp.tanh(pre[:, :half])                  # [l_pre | r_pre]   -> tanh
    g = jax.nn.sigmoid(pre[:, half:])            # [lg_pre | rg_pre] -> sigmoid
    out_ref[...] = (t * g).astype(out_ref.dtype)  # [l_child | r_child]


def _pick_batch_tiling(B):
    """Return (B_pad, bt): pad only to the 8-row sublane granule, pick a tile
    that divides B_pad, <=1024 rows, and gives >=2 grid steps for large B so
    both v7x TensorCores are used."""
    B_pad = pl.cdiv(B, 8) * 8
    if B_pad <= 256:
        return B_pad, B_pad                       # single step; latency-bound
    n_steps = max(2, pl.cdiv(B_pad, 1024))
    bt = pl.cdiv(pl.cdiv(B_pad, n_steps), 8) * 8
    return n_steps * bt, bt


def node_generater_forward(node_embedding, node_label, current_context, params,
                           *, out_dtype=jnp.float32):
    """JAX/Pallas equivalent of NodeGenerater.forward (eval mode).

    node_embedding:  [B, 1, H] float32
    node_label:      [B]       int32
    current_context: [B, 1, H] float32
    returns: (l_child [B, H], r_child [B, H], node_label_ [B, E])
    """
    emb_table = params["embeddings"]                          # [op_nums, E]
    node_label_ = jnp.take(emb_table, node_label, axis=0)     # [B, E]

    ne = jnp.squeeze(node_embedding, axis=1)                  # [B, H]
    cc = jnp.squeeze(current_context, axis=1)                 # [B, H]
    B, H = ne.shape
    E = node_label_.shape[1]

    # Dropout is identity in eval mode.
    w_ne, w_cc, w_lab = params["W_ne"], params["W_cc"], params["W_lab"]  # bf16
    b_all = params["b_all"]                                   # [1, 4H] f32

    B_pad, bt = _pick_batch_tiling(B)
    lab = node_label_
    if B_pad != B:
        pad = ((0, B_pad - B), (0, 0))
        ne, cc, lab = jnp.pad(ne, pad), jnp.pad(cc, pad), jnp.pad(lab, pad)
    grid = (B_pad // bt,)

    out = pl.pallas_call(
        _node_gen_kernel,
        out_shape=jax.ShapeDtypeStruct((B_pad, 2 * H), out_dtype),
        grid=grid,
        in_specs=[
            pl.BlockSpec((bt, H), lambda i: (i, 0)),          # node_embedding
            pl.BlockSpec((bt, H), lambda i: (i, 0)),          # current_context
            pl.BlockSpec((bt, E), lambda i: (i, 0)),          # node_label_
            pl.BlockSpec((H, 4 * H), lambda i: (0, 0)),       # W_ne (resident)
            pl.BlockSpec((H, 4 * H), lambda i: (0, 0)),       # W_cc (resident)
            pl.BlockSpec((E, 4 * H), lambda i: (0, 0)),       # W_lab (resident)
            pl.BlockSpec((1, 4 * H), lambda i: (0, 0)),       # fused biases
        ],
        out_specs=pl.BlockSpec((bt, 2 * H), lambda i: (i, 0)),
        compiler_params=pltpu.CompilerParams(
            dimension_semantics=("parallel",)),
    )(ne, cc, lab, w_ne, w_cc, w_lab, b_all)

    out = out[:B]
    l_child = out[:, :H]
    r_child = out[:, H:]
    return l_child, r_child, node_label_


def init_params(key, hidden_size, op_nums, embedding_size):
    """Deterministic synthetic params; shapes match the PyTorch module.  The
    four Linear layers are pre-packed column-wise as [W_l|W_r|W_lg|W_rg] and
    then row-split by input segment: W_ne [H,4H], W_cc [H,4H], W_lab [E,4H]
    (bf16); b_all = [b_l|b_r|b_lg|b_rg] (f32)."""
    in_dim = hidden_size * 2 + embedding_size
    keys = jax.random.split(key, 9)
    scale = 1.0 / jnp.sqrt(in_dim)

    def lin_w(k):
        # Stored as [in_dim, hidden] so the kernel does x @ W.
        return jax.random.uniform(k, (in_dim, hidden_size), jnp.float32, -scale, scale)

    def lin_b(k):
        return jax.random.uniform(k, (1, hidden_size), jnp.float32, -scale, scale)

    W_l, W_r, W_lg, W_rg = lin_w(keys[1]), lin_w(keys[3]), lin_w(keys[5]), lin_w(keys[7])
    b_l, b_r, b_lg, b_rg = lin_b(keys[2]), lin_b(keys[4]), lin_b(keys[6]), lin_b(keys[8])

    W_all = jnp.concatenate([W_l, W_r, W_lg, W_rg], axis=1)   # [in_dim, 4H] f32
    H = hidden_size
    return {
        "embeddings": jax.random.normal(keys[0], (op_nums, embedding_size), jnp.float32),
        "W_ne": W_all[:H].astype(jnp.bfloat16),               # [H, 4H]
        "W_cc": W_all[H:2 * H].astype(jnp.bfloat16),          # [H, 4H]
        "W_lab": W_all[2 * H:].astype(jnp.bfloat16),          # [E, 4H]
        "b_all": jnp.concatenate([b_l, b_r, b_lg, b_rg], axis=1),  # [1, 4H] f32
        "W_all_f32": W_all,                                   # reference only
    }


if __name__ == "__main__":
    hidden_size = 32
    embedding_size = 32
    op_nums = 5
    batch = 8

    key = jax.random.PRNGKey(0)
    kp, k1, k2, k3 = jax.random.split(key, 4)

    params = init_params(kp, hidden_size, op_nums, embedding_size)

    node_embedding = jax.random.normal(k1, (batch, 1, hidden_size), jnp.float32)
    current_context = jax.random.normal(k2, (batch, 1, hidden_size), jnp.float32)
    node_label = jax.random.randint(k3, (batch,), 0, op_nums, jnp.int32)

    l_child, r_child, node_label_ = node_generater_forward(
        node_embedding, node_label, current_context, params)
    jax.block_until_ready((l_child, r_child, node_label_))

    # Reference check: same split-dot math in plain JAX with identical bf16
    # weight/activation cast and f32 accumulation / gating.  (Parity with the
    # pure-f32 PyTorch module is ~1e-3 relative due to the bf16 MXU inputs.)
    H = hidden_size
    ne_r = node_embedding[:, 0, :]
    cc_r = current_context[:, 0, :]
    lab_r = jnp.take(params["embeddings"], node_label, axis=0)
    pre_ref = (
        jnp.dot(ne_r.astype(jnp.bfloat16), params["W_ne"],
                preferred_element_type=jnp.float32)
        + jnp.dot(cc_r.astype(jnp.bfloat16), params["W_cc"],
                  preferred_element_type=jnp.float32)
        + jnp.dot(lab_r.astype(jnp.bfloat16), params["W_lab"],
                  preferred_element_type=jnp.float32)
        + params["b_all"]
    )
    l_ref = jnp.tanh(pre_ref[:, :H]) * jax.nn.sigmoid(pre_ref[:, 2 * H:3 * H])
    r_ref = jnp.tanh(pre_ref[:, H:2 * H]) * jax.nn.sigmoid(pre_ref[:, 3 * H:])
    assert jnp.allclose(l_child, l_ref, atol=2e-3, rtol=2e-3), "l_child mismatch"
    assert jnp.allclose(r_child, r_ref, atol=2e-3, rtol=2e-3), "r_child mismatch"
    assert node_label_.shape == (batch, embedding_size)
    assert l_child.shape == (batch, hidden_size) and r_child.shape == (batch, hidden_size)

    print("KERNEL_OK")
</pallas_src>

<mosaic_0001>
module attributes {stable_mosaic.version = 11 : i64} {
  func.func @_node_gen_kernel(%arg0: i32, %arg1: memref<8x32xf32, #tpu.memory_space<vmem>>, %arg2: memref<8x32xf32, #tpu.memory_space<vmem>>, %arg3: memref<8x32xf32, #tpu.memory_space<vmem>>, %arg4: memref<32x128xbf16, #tpu.memory_space<vmem>>, %arg5: memref<32x128xbf16, #tpu.memory_space<vmem>>, %arg6: memref<32x128xbf16, #tpu.memory_space<vmem>>, %arg7: memref<1x128xf32, #tpu.memory_space<vmem>>, %arg8: memref<8x64xf32, #tpu.memory_space<vmem>>) attributes {dimension_semantics = [#tpu.dimension_semantics<parallel>], iteration_bounds = array<i64: 1>, scalar_prefetch = 0 : i64, scratch_operands = 0 : i64, tpu.core_type = #tpu.core_type<tc>, window_params = [{transform_indices = @transform_0, window_bounds = array<i64: 8, 32>}, {transform_indices = @transform_1, window_bounds = array<i64: 8, 32>}, {transform_indices = @transform_2, window_bounds = array<i64: 8, 32>}, {pipeline_mode = #tpu.pipeline_mode<synchronous>, transform_indices = @transform_3, window_bounds = array<i64: 32, 128>}, {pipeline_mode = #tpu.pipeline_mode<synchronous>, transform_indices = @transform_4, window_bounds = array<i64: 32, 128>}, {pipeline_mode = #tpu.pipeline_mode<synchronous>, transform_indices = @transform_5, window_bounds = array<i64: 32, 128>}, {pipeline_mode = #tpu.pipeline_mode<synchronous>, transform_indices = @transform_6, window_bounds = array<i64: 1, 128>}, {transform_indices = @transform_7, window_bounds = array<i64: 8, 64>}]} {
    %c0 = arith.constant 0 : index
    %c0_0 = arith.constant 0 : index
    %0 = vector.load %arg1[%c0, %c0_0] : memref<8x32xf32, #tpu.memory_space<vmem>>, vector<8x32xf32>
    %1 = arith.truncf %0 : vector<8x32xf32> to vector<8x32xbf16>
    %c0_1 = arith.constant 0 : index
    %c0_2 = arith.constant 0 : index
    %2 = vector.load %arg4[%c0_1, %c0_2] : memref<32x128xbf16, #tpu.memory_space<vmem>>, vector<32x128xbf16>
    %cst = arith.constant dense<0.000000e+00> : vector<8x128xf32>
    %3 = tpu.matmul %1, %2, %cst {dimension_numbers = #tpu.dot_dimension_numbers<[1], [0], [0], [1], [0, 0, 1, 1], [], []>} : vector<8x32xbf16>, vector<32x128xbf16>, vector<8x128xf32> -> vector<8x128xf32>
    %c0_3 = arith.constant 0 : index
    %c0_4 = arith.constant 0 : index
    %4 = vector.load %arg2[%c0_3, %c0_4] : memref<8x32xf32, #tpu.memory_space<vmem>>, vector<8x32xf32>
    %5 = arith.truncf %4 : vector<8x32xf32> to vector<8x32xbf16>
    %c0_5 = arith.constant 0 : index
    %c0_6 = arith.constant 0 : index
    %6 = vector.load %arg5[%c0_5, %c0_6] : memref<32x128xbf16, #tpu.memory_space<vmem>>, vector<32x128xbf16>
    %cst_7 = arith.constant dense<0.000000e+00> : vector<8x128xf32>
    %7 = tpu.matmul %5, %6, %cst_7 {dimension_numbers = #tpu.dot_dimension_numbers<[1], [0], [0], [1], [0, 0, 1, 1], [], []>} : vector<8x32xbf16>, vector<32x128xbf16>, vector<8x128xf32> -> vector<8x128xf32>
    %8 = arith.addf %3, %7 : vector<8x128xf32>
    %c0_8 = arith.constant 0 : index
    %c0_9 = arith.constant 0 : index
    %9 = vector.load %arg3[%c0_8, %c0_9] : memref<8x32xf32, #tpu.memory_space<vmem>>, vector<8x32xf32>
    %10 = arith.truncf %9 : vector<8x32xf32> to vector<8x32xbf16>
    %c0_10 = arith.constant 0 : index
    %c0_11 = arith.constant 0 : index
    %11 = vector.load %arg6[%c0_10, %c0_11] : memref<32x128xbf16, #tpu.memory_space<vmem>>, vector<32x128xbf16>
    %cst_12 = arith.constant dense<0.000000e+00> : vector<8x128xf32>
    %12 = tpu.matmul %10, %11, %cst_12 {dimension_numbers = #tpu.dot_dimension_numbers<[1], [0], [0], [1], [0, 0, 1, 1], [], []>} : vector<8x32xbf16>, vector<32x128xbf16>, vector<8x128xf32> -> vector<8x128xf32>
    %13 = arith.addf %8, %12 : vector<8x128xf32>
    %c0_13 = arith.constant 0 : index
    %c0_14 = arith.constant 0 : index
    %14 = vector.load %arg7[%c0_13, %c0_14] : memref<1x128xf32, #tpu.memory_space<vmem>>, vector<1x128xf32>
    %15 = vector.broadcast %14 : vector<1x128xf32> to vector<8x128xf32>
    %16 = arith.addf %13, %15 : vector<8x128xf32>
    %17 = vector.extract_strided_slice %16 {offsets = [0, 0], sizes = [8, 64], strides = [1, 1]} : vector<8x128xf32> to vector<8x64xf32>
    %18 = math.tanh %17 : vector<8x64xf32>
    %19 = vector.extract_strided_slice %16 {offsets = [0, 64], sizes = [8, 64], strides = [1, 1]} : vector<8x128xf32> to vector<8x64xf32>
    %20 = arith.negf %19 : vector<8x64xf32>
    %21 = math.exp %20 : vector<8x64xf32>
    %cst_15 = arith.constant 1.000000e+00 : f32
    %22 = vector.broadcast %cst_15 : f32 to vector<8x64xf32>
    %23 = arith.addf %22, %21 : vector<8x64xf32>
    %24 = arith.divf %22, %23 : vector<8x64xf32>
    %25 = arith.mulf %18, %24 : vector<8x64xf32>
    %c0_16 = arith.constant 0 : index
    %c0_17 = arith.constant 0 : index
    %26 = vector.load %arg8[%c0_16, %c0_17] : memref<8x64xf32, #tpu.memory_space<vmem>>, vector<8x64xf32>
    tpu.vector_store %arg8[%c0_16, %c0_17], %25 {strides = array<i32>} : memref<8x64xf32, #tpu.memory_space<vmem>>, vector<8x64xf32>,
    return
  }
  func.func @transform_0(%arg0: i32) -> (i32, i32) {
    %c0_i32 = arith.constant 0 : i32
    %c0_i32_0 = arith.constant 0 : i32
    return %arg0, %c0_i32 : i32, i32
  }
  func.func @transform_1(%arg0: i32) -> (i32, i32) {
    %c0_i32 = arith.constant 0 : i32
    %c0_i32_0 = arith.constant 0 : i32
    return %arg0, %c0_i32 : i32, i32
  }
  func.func @transform_2(%arg0: i32) -> (i32, i32) {
    %c0_i32 = arith.constant 0 : i32
    %c0_i32_0 = arith.constant 0 : i32
    return %arg0, %c0_i32 : i32, i32
  }
  func.func @transform_3(%arg0: i32) -> (i32, i32) {
    %c0_i32 = arith.constant 0 : i32
    %c0_i32_0 = arith.constant 0 : i32
    %c0_i32_1 = arith.constant 0 : i32
    return %c0_i32, %c0_i32_0 : i32, i32
  }
  func.func @transform_4(%arg0: i32) -> (i32, i32) {
    %c0_i32 = arith.constant 0 : i32
    %c0_i32_0 = arith.constant 0 : i32
    %c0_i32_1 = arith.constant 0 : i32
    return %c0_i32, %c0_i32_0 : i32, i32
  }
  func.func @transform_5(%arg0: i32) -> (i32, i32) {
    %c0_i32 = arith.constant 0 : i32
    %c0_i32_0 = arith.constant 0 : i32
    %c0_i32_1 = arith.constant 0 : i32
    return %c0_i32, %c0_i32_0 : i32, i32
  }
  func.func @transform_6(%arg0: i32) -> (i32, i32) {
    %c0_i32 = arith.constant 0 : i32
    %c0_i32_0 = arith.constant 0 : i32
    %c0_i32_1 = arith.constant 0 : i32
    return %c0_i32, %c0_i32_0 : i32, i32
  }
  func.func @transform_7(%arg0: i32) -> (i32, i32) {
    %c0_i32 = arith.constant 0 : i32
    %c0_i32_0 = arith.constant 0 : i32
    return %arg0, %c0_i32 : i32, i32
  }
}

</mosaic_0001>

<bundles_post_ra>
// kernel: tpu_custom_call.1
= control target key start
LH: loop header
LB: loop body
LE: loop exit
PB: predicated region body
PF: predicated region fallthrough
CT: control target
= control target key end

     0   :  { %12 = vsyncpa [#allocation3], 0  ;;  %s668_s0 = inlined_call_operand.hbm [shape: f32[8,32], index: 0, kind: input, shape index: {}]   ;;  %s669_s1 = inlined_call_operand.hbm [shape: f32[8,32], index: 1, kind: input, shape index: {}]   ;;  %s670_s2 = inlined_call_operand.hbm [shape: f32[8,32], index: 2, kind: input, shape index: {}]   ;;  %s671_s3 = inlined_call_operand.hbm [shape: bf16[32,128], index: 3, kind: input, shape index: {}]   ;;  %s672_s4 = inlined_call_operand.hbm [shape: bf16[32,128], index: 4, kind: input, shape index: {}]   ;;  %s673_s5 = inlined_call_operand.vmem [shape: bf16[32,128], index: 5, kind: input, shape index: {}]   ;;  %s674_s6 = inlined_call_operand.vmem [shape: f32[1,128], index: 6, kind: input, shape index: {}]   ;;  %s675_s7 = inlined_call_operand.hbm [shape: f32[8,64], index: 7, kind: output, shape index: {}]  }
   0x1   :  { %13 = vsyncpa [#allocation6], 0 }
   0x2   :  { %14 = vsyncpa [#allocation9], 0 }
   0x3   :  { %15 = vsyncpa [#allocation4], 0  ;;  %s520_s24 = smov [#allocation5]   ;;  %s521_s26 = smov [#allocation8]  }
   0x4   :  { %s32_s25 = sshll.u32 %s520_s24, 4  ;;  %s51_s27 = sshll.u32 %s521_s26, 4  ;;  %s33_s25 = int_to_ptr.vmem [resolvable:$true] %s32_s25  ;;  %s570_s27 = int_to_ptr.vmem [resolvable:$true] %s51_s27 }
   0x5   :  { %s380_s30 = scalar_lea.hbm %s669_s1, 128 }
   0x6   :  { %p381_p0 = scmp.ne.s32.totalorder %s669_s1, %s380_s30  ;;  %p384_p1 = scmp.lt.u32.totalorder %s380_s30, %s669_s1 }
   0x8   :  { %p386_p2 = pnand %p384_p1, %p381_p0 }
   0xa   :  { %389 = shalt.err (!%p386_p2)
}
   0xb   :  { %s390_s12 = scalar_lea.vmem %s33_s25, 128  ;;  %p395_p4 = scmp.lt.s32.totalorder %s33_s25, %s33_s25 }
   0xc   :  { %p391_p3 = scmp.ne.s32.totalorder %s33_s25, %s390_s12  ;;  %p396_p5 = scmp.lt.s32.totalorder %s390_s12, %s390_s12 }
   0xe   :  { %p397_p6 = por %p396_p5, %p395_p4 }
  0x10   :  { %p398_p7 = pnand %p397_p6, %p391_p3 }
  0x12   :  { %401 = shalt.err (!%p398_p7)
}
  0x13   :  { %35 = dma.hbm_to_vmem [thread:$0]  %s669_s1, 128, %s33_s25, [#allocation6]  }
  0x14   :  { %s402_s17 = scalar_lea.hbm %s671_s3, 256 }
  0x15   :  { %p403_p8 = scmp.ne.s32.totalorder %s671_s3, %s402_s17  ;;  %p406_p9 = scmp.lt.u32.totalorder %s402_s17, %s671_s3 }
  0x17   :  { %p408_p10 = pnand %p406_p9, %p403_p8 }
  0x19   :  { %411 = shalt.err (!%p408_p10)
}
  0x1a   :  { %s412_s22 = scalar_lea.vmem %s570_s27, 256  ;;  %p417_p12 = scmp.lt.s32.totalorder %s570_s27, %s570_s27 }
  0x1b   :  { %p413_p11 = scmp.ne.s32.totalorder %s570_s27, %s412_s22  ;;  %p418_p13 = scmp.lt.s32.totalorder %s412_s22, %s412_s22 }
  0x1d   :  { %p419_p0 = por %p418_p13, %p417_p12 }
  0x1f   :  { %p420_p1 = pnand %p419_p0, %p413_p11 }
  0x21   :  { %423 = shalt.err (!%p420_p1)
}
  0x22   :  { %s522_s1 = smov 64   ;;  %s523_s23 = smov 4  }
  0x23   :  { %57 = dma.hbm_to_vmem [thread:$0]  %s671_s3, 256, %s570_s27, [#allocation9], %s522_s1, %s522_s1, %s523_s23  }
  0x24   :  { %s524_s26 = smov [#allocation2]   ;;  %s525_s29 = smov [#allocation7]  }
  0x25   :  { %s22_s28 = sshll.u32 %s524_s26, 4  ;;  %s42_s30 = sshll.u32 %s525_s29, 4  ;;  %s23_s28 = int_to_ptr.vmem [resolvable:$true] %s22_s28  ;;  %s43_s30 = int_to_ptr.vmem [resolvable:$true] %s42_s30 }
  0x26   :  { %s424_s10 = scalar_lea.hbm %s668_s0, 128 }
  0x27   :  { %p425_p2 = scmp.ne.s32.totalorder %s668_s0, %s424_s10  ;;  %p428_p3 = scmp.lt.u32.totalorder %s424_s10, %s668_s0 }
  0x29   :  { %p430_p4 = pnand %p428_p3, %p425_p2 }
  0x2b   :  { %433 = shalt.err (!%p430_p4)
}
  0x2c   :  { %s434_s3 = scalar_lea.vmem %s23_s28, 128  ;;  %p439_p6 = scmp.lt.s32.totalorder %s23_s28, %s23_s28 }
  0x2d   :  { %p435_p5 = scmp.ne.s32.totalorder %s23_s28, %s434_s3  ;;  %p440_p7 = scmp.lt.s32.totalorder %s434_s3, %s434_s3 }
  0x2f   :  { %p441_p8 = por %p440_p7, %p439_p6 }
  0x31   :  { %p442_p9 = pnand %p441_p8, %p435_p5 }
  0x33   :  { %445 = shalt.err (!%p442_p9)
}
  0x34   :  { %25 = dma.hbm_to_vmem [thread:$0]  %s668_s0, 128, %s23_s28, [#allocation3]  }
  0x35   :  { %s446_s18 = scalar_lea.hbm %s670_s2, 128 }
  0x36   :  { %p447_p10 = scmp.ne.s32.totalorder %s670_s2, %s446_s18  ;;  %p450_p11 = scmp.lt.u32.totalorder %s446_s18, %s670_s2 }
  0x38   :  { %p452_p12 = pnand %p450_p11, %p447_p10 }
  0x3a   :  { %455 = shalt.err (!%p452_p12)
}
  0x3b   :  { %s456_s24 = scalar_lea.vmem %s43_s30, 128  ;;  %p461_p0 = scmp.lt.s32.totalorder %s43_s30, %s43_s30 }
  0x3c   :  { %p457_p13 = scmp.ne.s32.totalorder %s43_s30, %s456_s24  ;;  %p462_p1 = scmp.lt.s32.totalorder %s456_s24, %s456_s24 }
  0x3e   :  { %p463_p2 = por %p462_p1, %p461_p0 }
  0x40   :  { %p464_p3 = pnand %p463_p2, %p457_p13 }
  0x42   :  { %467 = shalt.err (!%p464_p3)
}
  0x43   :  { %45 = dma.hbm_to_vmem [thread:$0]  %s670_s2, 128, %s43_s30, [#allocation6]  }
  0x44   :  { %s526_s26 = smov [#allocation10]   ;;  %s468_s9 = scalar_lea.hbm %s672_s4, 256 }
  0x45   :  { %s63_s28 = sshll.u32 %s526_s26, 4  ;;  %p469_p4 = scmp.ne.s32.totalorder %s672_s4, %s468_s9  ;;  %s64_s28 = int_to_ptr.vmem [resolvable:$true] %s63_s28 }
  0x46   :  { %p472_p5 = scmp.lt.u32.totalorder %s468_s9, %s672_s4 }
  0x48   :  { %p474_p6 = pnand %p472_p5, %p469_p4 }
  0x4a   :  { %477 = shalt.err (!%p474_p6)
}
  0x4b   :  { %s478_s14 = scalar_lea.vmem %s64_s28, 256  ;;  %p483_p8 = scmp.lt.s32.totalorder %s64_s28, %s64_s28 }
  0x4c   :  { %p479_p7 = scmp.ne.s32.totalorder %s64_s28, %s478_s14  ;;  %p484_p9 = scmp.lt.s32.totalorder %s478_s14, %s478_s14 }
  0x4e   :  { %p485_p10 = por %p484_p9, %p483_p8 }
  0x50   :  { %p486_p11 = pnand %p485_p10, %p479_p7 }
  0x52   :  { %489 = shalt.err (!%p486_p11)
}
  0x53   :  { %69 = dma.hbm_to_vmem [thread:$0]  %s672_s4, 256, %s64_s28, [#allocation9], %s522_s1, %s522_s1, %s523_s23  }
  0x54   :  { %512 = dma.done.wait [#allocation3], 128  }
  0x55   :  { %513 = vsyncadd [#allocation3], 4294967168 }
  0x56   :  { %514 = dma.done.wait [#allocation6], 256  }
  0x57   :  { %515 = vsyncadd [#allocation6], 4294967040 }
  0x58   :  { %516 = dma.done.wait [#allocation9], 512  }
  0x59   :  { %517 = vsyncadd [#allocation9], 4294966784  ;;  %v527_v0 = vmov 0.0   ;;  %vm528_vm0 = vmmov 0   ;;  %v368_v1 = vld [vmem:[#allocation10] sm:$0xff]   ;;  %v369_v2 = vld [vmem:[#allocation8] sm:$0xff]  }
  0x5a   :  { %334 = vmatprep.subr.bf16.mxu0 %v527_v0  ;;  %342 = vmatprep.subr.bf16.mxu1 %v527_v0  ;;  %v370_v3 = vld [vmem:[#allocation10 + $0x8] sm:$0xff]   ;;  %v371_v4 = vld [vmem:[#allocation8 + $0x8] sm:$0xff]   ;;  %v96_v5 = vld [vmem:[#allocation5] sm:$0xff]  ;;  %vm114_vm1 = vcmask 261120   ;;  %vm295_vm2 = vcmask 523264  }
  0x5b   :  { %338 = vmatprep.mubr.msk.bf16.mxu0 %vm528_vm0, %v527_v0  ;;  %346 = vmatprep.mubr.msk.bf16.mxu1 %vm528_vm0, %v527_v0  ;;  %v90_v6 = vld [vmem:[#allocation2] sm:$0xff]  ;;  %v97_v7 = vpack.c.bf16 %v96_v5, %v96_v5  ;;  %v372_v9 = vld [vmem:[%s673_s5] sm:$0xff]   ;;  %v373_v10 = vld [vmem:[%s673_s5 + $0x8] sm:$0xff]   ;;  %s529_s5 = smov [#allocation11]  }
  0x5c   :  { %335 = vmatpush3.bf16.msra.mxu0 %v368_v1  ;;  %343 = vmatpush3.bf16.msra.mxu1 %v369_v2  ;;  %v91_v8 = vpack.c.bf16 %v90_v6, %v90_v6  ;;  %v213_v11 = vld [vmem:[#allocation7] sm:$0xff]  ;;  %s303_s17 = sshll.u32 %s529_s5, 4  ;;  %s304_s17 = int_to_ptr.vmem [resolvable:$true] %s303_s17 }
  0x5d   :  { %336 = vmatprep.subr.bf16.mxu0 %v527_v0  ;;  %344 = vmatprep.subr.bf16.mxu1 %v527_v0  ;;  %v214_v12 = vpack.c.bf16 %v213_v11, %v213_v11  ;;  %v323_v23 = vld [vmem:[%s674_s6] ss:$0 sm:$0xff]  ;;  %s490_s6 = scalar_lea.vmem %s304_s17, 128  ;;  %p495_p13 = scmp.lt.s32.totalorder %s304_s17, %s304_s17 }
  0x5e   :  { %p491_p12 = scmp.ne.s32.totalorder %s304_s17, %s490_s6  ;;  %p496_p0 = scmp.lt.s32.totalorder %s490_s6, %s490_s6 }
  0x60   :  { %337 = vmatpush3.bf16.msra.mxu0 %v370_v3  ;;  %345 = vmatpush3.bf16.msra.mxu1 %v371_v4  ;;  %p497_p1 = por %p496_p0, %p495_p13 }
  0x61   :  { %350 = vmatprep.subr.bf16.mxu0 %v527_v0 }
  0x62   :  { %p498_p2 = pnand %p497_p1, %p491_p12 }
  0x63   :  { %339 = vmatmul.mubr.msk.bf16.vlgmr.msra.gmra.mrb[0].mxu0 %vm114_vm1, %v97_v7  ;;  %347 = vmatmul.mubr.msk.bf16.vlgmr.msra.gmra.mrb[0].mxu1 %vm114_vm1, %v91_v8 }
  0x64   :  { %351 = vmatpush3.bf16.msra.mxu0 %v372_v9  ;;  %354 = vmatprep.mubr.msk.bf16.mxu0 %vm528_vm0, %v527_v0 }
  0x65   :  { %352 = vmatprep.subr.bf16.mxu0 %v527_v0 }
  0x68   :  { %353 = vmatpush3.bf16.msra.mxu0 %v373_v10 }
  0x6b   :  { %355 = vmatmul.mubr.msk.bf16.vlgmr.msra.gmra.mrb[4].mxu0 %vm114_vm1, %v214_v12 }
 0x136   :  { %v152_v13 = vpop.f32.mrb[0].mxu0  ;;  %v207_v15 = vpop.f32.mrb[0].mxu1 }
 0x137   :  { %v340_v14 = vpop.f32.mrb[1].mxu0  ;;  %v208_v16 = vadd.f32 %v207_v15, %v152_v13  ;;  %v348_v18 = vpop.f32.mrb[1].mxu1 }
 0x138   :  { %v155_v17 = vpop.f32.mrb[2].mxu0  ;;  %v210_v20 = vpop.f32.mrb[2].mxu1 }
 0x139   :  { %v341_v19 = vpop.f32.mrb[3].mxu0  ;;  %v349_v21 = vpop.f32.mrb[3].mxu1 }
 0x13e   :  { %v268_v22 = vpop.f32.mrb[4].mxu0 }
 0x13f   :  { %v274_v24 = vadd.f32 %v268_v22, %v208_v16  ;;  %v356_v25 = vpop.f32.mrb[5].mxu0 }
 0x140   :  { %v271_v26 = vpop.f32.mrb[6].mxu0 }
 0x141   :  { %v282_v27 = vadd.f32 %v323_v23, %v274_v24  ;;  %v357_v28 = vpop.f32.mrb[7].mxu0 }
 0x143   :  { %v324_v29 = vmul.f32 -1.442695, %v282_v27 }
 0x145   :  { %374 = vpow2.f32 %v324_v29 }
 0x14f   :  { %v375_v30 = vpop.eup %374 }
 0x150   :  { %v287_v31 = vadd.f32 1.0, %v375_v30 }
 0x152   :  { %376 = vrcp.f32 %v287_v31 }
 0x153   :  { %378 = vtanh.f32 %v282_v27 }
 0x15c   :  { %v377_v32 = vpop.eup %376 }
 0x15d   :  { %291 = vrot.lane.b32.xlu0 %v377_v32, %s522_s1  ;;  %v379_v33 = vpop.eup %378 }
 0x1cf   :  { %v292_v34 = vpop.permute.xlu0 %291 }
 0x1d0   :  { %v294_v35 = vmul.f32 %v379_v33, %v292_v34 }
 0x1d2   :  { %296 = vst.msk [vmem:[#allocation11] sm:$0xff] %vm295_vm2, %v294_v35 }
 0x1d3   :  { %501 = shalt.err (!%p498_p2)
}
 0x1d4   :  { %s502_s1 = scalar_lea.hbm %s675_s7, 128 }
 0x1d5   :  { %p503_p3 = scmp.ne.s32.totalorder %s675_s7, %s502_s1  ;;  %p506_p4 = scmp.lt.u32.totalorder %s502_s1, %s675_s7 }
 0x1d7   :  { %p508_p5 = pnand %p506_p4, %p503_p3 }
 0x1d9   :  { %511 = shalt.err (!%p508_p5)
}
 0x1da   :  { %306 = dma.vmem_to_hbm [thread:$0]  %s304_s17, 128, %s675_s7, [#allocation4]  }
 0x1db   :  { %518 = dma.done.wait [#allocation4], 128  }
 0x1dc   :  { %519 = vsyncadd [#allocation4], 4294967168 }
 0x1dd   :  { %310 = vsyncpa [#allocation3], 1 }
 0x1de   :  { %311 = vsyncpa [#allocation6], 1 }
 0x1df   :  { %312 = vsyncpa [#allocation9], 1 }
 0x1e0   :  { %313 = vsyncpa [#allocation4], 1 }

</bundles_post_ra>
